<compile_context>
chip_gen: v6e
topology: v6e:2x2x1
jax: 0.10.0
libtpu: 0.0.40
codegen_flags: <defaults>
</compile_context>

<pallas_src>
import functools

import jax
import jax.numpy as jnp
from jax.experimental import pallas as pl
from jax.experimental.pallas import tpu as pltpu


def _bottleneck_kernel(x_ref, w14_ref, b14_ref, w2_ref, b2_ref,
                       w3_ref, b3_ref, mask_ref, o_ref,
                       *, mid, Ho, Wo, taps, downsample, nb):
    """NB batch images per grid step. All activations are (channels, H*W) bf16.

    x_ref   : (nb, Cin, L)            flattened-NCHW input tile (bf16)
    w14/b14 : downsample=True : (mid+Cout, Cin) bf16 / (mid+Cout, 1) f32
              downsample=False: (mid, Cin)      bf16 / (mid, 1)      f32
    w2/b2   : (mid, 9*mid) bf16 / (mid, 1) f32   dilated 3x3 conv (BN folded)
    w3/b3   : (Cout, mid)  bf16 / (Cout, 1) f32  increase 1x1 conv (BN folded)
    mask_ref: (9, L) f32    per-tap spatial validity masks (conv zero padding)
    o_ref   : (nb, Cout, L) f32
    """
    L = Ho * Wo
    # Hoist all weight / bias / mask loads out of the per-image loop.
    w14 = w14_ref[...]
    b14 = b14_ref[...]
    w2 = w2_ref[...]
    b2 = b2_ref[...]
    w3 = w3_ref[...]
    b3 = b3_ref[...]
    masks = mask_ref[...]                                        # (9, L) f32
    mask_rows = [masks[t:t + 1, :] for t in range(len(taps))]    # 9 x (1, L)

    for i in range(nb):                                          # static unroll
        x = x_ref[i]                                             # (Cin, L) bf16

        # ---- fused reduce (+ optional projection shortcut): one MXU matmul ----
        h = jnp.dot(w14, x, preferred_element_type=jnp.float32) + b14
        if downsample:
            h1 = jnp.maximum(h[:mid, :], 0.0)                    # (mid, L)
            sc = h[mid:, :]                                      # (Cout, L)
        else:
            h1 = jnp.maximum(h, 0.0)                             # (mid, L)
            sc = x.astype(jnp.float32)                           # identity shortcut

        # ---- dilated 3x3 conv (+BN) + ReLU as ONE K = 9*mid matmul ----
        # Each tap (dr, dc) of the dilated stencil is a lane rotation of the
        # row-major flattened spatial axis by dr*Wo + dc; rotation wrap-around
        # and the conv's zero padding are both handled by the precomputed mask.
        patches = []
        for t, (dr, dc) in enumerate(taps):
            s = dr * Wo + dc
            if s == 0:
                patches.append(h1)
            else:
                shifted = pltpu.roll(h1, (-s) % L, 1)   # shifted[:,p] == h1[:,(p+s)%L]
                patches.append(shifted * mask_rows[t])
        im2col = jnp.concatenate(patches, axis=0).astype(jnp.bfloat16)  # (9*mid, L)
        h2 = jnp.dot(w2, im2col, preferred_element_type=jnp.float32)
        h2 = jnp.maximum(h2 + b2, 0.0)                           # (mid, L)

        # ---- increase: 1x1 conv (+BN), no ReLU -> (Cout, L) ----
        h3 = jnp.dot(w3, h2.astype(jnp.bfloat16),
                     preferred_element_type=jnp.float32) + b3

        # ---- residual add + final ReLU ----
        o_ref[i] = jnp.maximum(h3 + sc, 0.0).astype(o_ref.dtype)


def _fold_bn(w, gamma, beta, mean, var, *, eps=1e-5):
    """Fold an inference-mode BatchNorm2d into the preceding bias-free conv."""
    scale = gamma / jnp.sqrt(var + eps)
    w_f = w.astype(jnp.float32) * scale[:, None, None, None]
    b_f = (beta - mean * scale).astype(jnp.float32)
    return w_f, b_f


def bottleneck_forward(x_nchw, reduce_p, conv3x3_p, increase_p, shortcut_p=None,
                       *, stride=1, dilation=1, eps=1e-5, nb=2):
    """_Bottleneck.forward (inference). Each *_p is (w, gamma, beta, mean, var).
    shortcut_p=None means downsample=False (identity shortcut; requires
    Cin == Cout and stride == 1, exactly as the PyTorch module assumes)."""
    # A 1x1 conv with stride s (padding 0) equals a stride-1 1x1 conv on the
    # spatially subsampled input (no-op for s=1, which the demo uses).
    if stride != 1:
        x_nchw = x_nchw[:, :, ::stride, ::stride]
    N, Cin, Ho, Wo = x_nchw.shape
    L = Ho * Wo

    w1, b1 = _fold_bn(*reduce_p, eps=eps)          # (mid, Cin, 1, 1)
    w2, b2 = _fold_bn(*conv3x3_p, eps=eps)         # (mid, mid, 3, 3)
    w3, b3 = _fold_bn(*increase_p, eps=eps)        # (Cout, mid, 1, 1)
    mid, Cout = w1.shape[0], w3.shape[0]
    downsample = shortcut_p is not None

    if downsample:
        w4, b4 = _fold_bn(*shortcut_p, eps=eps)    # (Cout, Cin, 1, 1)
        # Fuse reduce + shortcut into one (mid+Cout, Cin) weight: x goes through
        # the MXU once, rows are split back apart inside the kernel.
        w14 = jnp.concatenate([w1.reshape(mid, Cin), w4.reshape(Cout, Cin)], axis=0)
        b14 = jnp.concatenate([b1, b4], axis=0).reshape(mid + Cout, 1)
        rows14 = mid + Cout
    else:
        assert Cin == Cout, "identity shortcut requires in_ch == out_ch"
        w14 = w1.reshape(mid, Cin)
        b14 = b1.reshape(mid, 1)
        rows14 = mid

    # Flatten the 9 taps to match the kernel's im2col row order:
    # row (kh*3 + kw)*mid + c  <->  W[o, c, kh, kw].
    w2f = jnp.transpose(w2, (0, 2, 3, 1)).reshape(mid, 9 * mid)
    w3f = w3.reshape(Cout, mid)

    # bf16 MXU inputs; biases/masks stay f32 (added to f32 accumulators).
    w14 = w14.astype(jnp.bfloat16)
    w2f = w2f.astype(jnp.bfloat16)
    w3f = w3f.astype(jnp.bfloat16)
    b14 = b14.astype(jnp.float32)
    b2v = b2.reshape(mid, 1).astype(jnp.float32)
    b3v = b3.reshape(Cout, 1).astype(jnp.float32)

    # (N, C, H, W) -> (N, C, H*W) is a contiguous collapse: no data movement.
    x_flat = x_nchw.astype(jnp.bfloat16).reshape(N, Cin, L)

    d = dilation
    taps = tuple(((kh - 1) * d, (kw - 1) * d) for kh in range(3) for kw in range(3))

    # Precompute the 9 per-tap validity masks once (handles both conv zero
    # padding and roll wrap-around); tiny (9, L) input, constant across grid.
    pos = jnp.arange(L, dtype=jnp.int32)
    row, col = pos // Wo, pos % Wo
    masks = jnp.stack(
        [((row + dr >= 0) & (row + dr < Ho) &
          (col + dc >= 0) & (col + dc < Wo)).astype(jnp.float32)
         for (dr, dc) in taps], axis=0)                          # (9, L)

    # Batch nb images per grid step (amortizes per-step overhead); ensure nb | N.
    nb = max(1, min(nb, N))
    while N % nb:
        nb -= 1
    grid = (N // nb,)

    kernel = functools.partial(_bottleneck_kernel, mid=mid, Ho=Ho, Wo=Wo,
                               taps=taps, downsample=downsample, nb=nb)

    flops = 2 * N * L * (rows14 * Cin + mid * 9 * mid + Cout * mid)
    bytes_accessed = (x_flat.size * 2 + N * Cout * L * 4
                      + (w14.size + w2f.size + w3f.size) * 2
                      + (b14.size + b2v.size + b3v.size + masks.size) * 4)

    out_flat = pl.pallas_call(
        kernel,
        out_shape=jax.ShapeDtypeStruct((N, Cout, L), jnp.float32),
        grid_spec=pltpu.PrefetchScalarGridSpec(
            num_scalar_prefetch=0,
            grid=grid,
            in_specs=[
                pl.BlockSpec((nb, Cin, L), lambda g: (g, 0, 0)),
                pl.BlockSpec((rows14, Cin), lambda g: (0, 0)),
                pl.BlockSpec((rows14, 1), lambda g: (0, 0)),
                pl.BlockSpec((mid, 9 * mid), lambda g: (0, 0)),
                pl.BlockSpec((mid, 1), lambda g: (0, 0)),
                pl.BlockSpec((Cout, mid), lambda g: (0, 0)),
                pl.BlockSpec((Cout, 1), lambda g: (0, 0)),
                pl.BlockSpec((9, L), lambda g: (0, 0)),
            ],
            out_specs=pl.BlockSpec((nb, Cout, L), lambda g: (g, 0, 0)),
        ),
        compiler_params=pltpu.CompilerParams(
            dimension_semantics=("parallel",)),
        cost_estimate=pl.CostEstimate(
            flops=int(flops), transcendentals=0,
            bytes_accessed=int(bytes_accessed)),
    )(x_flat, w14, b14, w2f, b2v, w3f, b3v, masks)

    return out_flat.reshape(N, Cout, Ho, Wo)


# ----------------------- pure-JAX (XLA) reference ---------------------------

def _ref_conv_bn(x, p, *, stride=1, padding=0, dilation=1, relu=True, eps=1e-5):
    w, gamma, beta, mean, var = p
    y = jax.lax.conv_general_dilated(
        x.astype(jnp.float32), w.astype(jnp.float32),
        window_strides=(stride, stride),
        padding=[(padding, padding), (padding, padding)],
        rhs_dilation=(dilation, dilation),
        dimension_numbers=("NCHW", "OIHW", "NCHW"))
    scale = gamma / jnp.sqrt(var + eps)
    y = y * scale[None, :, None, None] + (beta - mean * scale)[None, :, None, None]
    return jnp.maximum(y, 0.0) if relu else y


def _ref_bottleneck(x, reduce_p, conv3x3_p, increase_p, shortcut_p,
                    *, stride=1, dilation=1, eps=1e-5):
    h = _ref_conv_bn(x, reduce_p, stride=stride, relu=True, eps=eps)
    h = _ref_conv_bn(h, conv3x3_p, padding=dilation, dilation=dilation,
                     relu=True, eps=eps)
    h = _ref_conv_bn(h, increase_p, relu=False, eps=eps)
    sc = (_ref_conv_bn(x, shortcut_p, stride=stride, relu=False, eps=eps)
          if shortcut_p is not None else x.astype(jnp.float32))
    return jnp.maximum(h + sc, 0.0)


def _make_conv_bn(key, cin, cout, ksize):
    kw, kg, kb, km, kv = jax.random.split(key, 5)
    w = 0.1 * jax.random.normal(kw, (cout, cin, ksize, ksize), jnp.float32)
    gamma = 1.0 + 0.1 * jax.random.normal(kg, (cout,), jnp.float32)
    beta = 0.1 * jax.random.normal(kb, (cout,), jnp.float32)
    mean = 0.1 * jax.random.normal(km, (cout,), jnp.float32)
    var = jax.random.uniform(kv, (cout,), jnp.float32, minval=0.5, maxval=1.5)
    return (w, gamma, beta, mean, var)


if __name__ == "__main__":
    # Small ResNet-bottleneck shapes: 16x16 spatial (H*W = 256 lanes), batch 4
    # processed 2 images per grid step (grid=(2,) keeps both v7x cores busy),
    # mid = out_ch // 4 = 8, dilation 2, stride 1.
    N, H, W = 4, 16, 16
    Cout = 32
    mid = Cout // 4            # _BOTTLENECK_EXPANSION = 4
    dilation = 2

    key = jax.random.PRNGKey(0)
    kx, k1, k2, k3, k4, kx2, k5, k6, k7 = jax.random.split(key, 9)

    # ---- case 1: downsample=True (projection shortcut), Cin != Cout ----
    Cin = 16
    x = jax.random.normal(kx, (N, Cin, H, W), jnp.float32)
    reduce_p = _make_conv_bn(k1, Cin, mid, 1)
    conv3x3_p = _make_conv_bn(k2, mid, mid, 3)
    increase_p = _make_conv_bn(k3, mid, Cout, 1)
    shortcut_p = _make_conv_bn(k4, Cin, Cout, 1)

    out = jax.block_until_ready(
        bottleneck_forward(x, reduce_p, conv3x3_p, increase_p, shortcut_p,
                           stride=1, dilation=dilation, nb=2))
    ref = jax.block_until_ready(
        _ref_bottleneck(x, reduce_p, conv3x3_p, increase_p, shortcut_p,
                        stride=1, dilation=dilation))
    assert out.shape == (N, Cout, H, W), out.shape
    # bf16 MXU inputs vs f32 XLA reference -> loosened tolerance.
    assert jnp.allclose(out, ref, atol=5e-2, rtol=5e-2), \
        float(jnp.max(jnp.abs(out - ref)))

    # ---- case 2: downsample=False (identity shortcut), Cin == Cout ----
    x2 = jax.random.normal(kx2, (N, Cout, H, W), jnp.float32)
    reduce2_p = _make_conv_bn(k5, Cout, mid, 1)
    conv3x3_2p = _make_conv_bn(k6, mid, mid, 3)
    increase2_p = _make_conv_bn(k7, mid, Cout, 1)

    out2 = jax.block_until_ready(
        bottleneck_forward(x2, reduce2_p, conv3x3_2p, increase2_p, None,
                           stride=1, dilation=dilation, nb=2))
    ref2 = jax.block_until_ready(
        _ref_bottleneck(x2, reduce2_p, conv3x3_2p, increase2_p, None,
                        stride=1, dilation=dilation))
    assert out2.shape == (N, Cout, H, W), out2.shape
    assert jnp.allclose(out2, ref2, atol=5e-2, rtol=5e-2), \
        float(jnp.max(jnp.abs(out2 - ref2)))

    print("KERNEL_OK")
</pallas_src>

<mosaic_0001>
module attributes {stable_mosaic.version = 11 : i64} {
  func.func @_bottleneck_kernel(%arg0: i32, %arg1: memref<2x16x256xbf16, #tpu.memory_space<vmem>>, %arg2: memref<40x16xbf16, #tpu.memory_space<vmem>>, %arg3: memref<40x1xf32, #tpu.memory_space<vmem>>, %arg4: memref<8x72xbf16, #tpu.memory_space<vmem>>, %arg5: memref<8x1xf32, #tpu.memory_space<vmem>>, %arg6: memref<32x8xbf16, #tpu.memory_space<vmem>>, %arg7: memref<32x1xf32, #tpu.memory_space<vmem>>, %arg8: memref<9x256xf32, #tpu.memory_space<vmem>>, %arg9: memref<2x32x256xf32, #tpu.memory_space<vmem>>) attributes {dimension_semantics = [#tpu.dimension_semantics<parallel>], iteration_bounds = array<i64: 2>, scalar_prefetch = 0 : i64, scratch_operands = 0 : i64, tpu.core_type = #tpu.core_type<tc>, window_params = [{transform_indices = @transform_0, window_bounds = array<i64: 2, 16, 256>}, {pipeline_mode = #tpu.pipeline_mode<synchronous>, transform_indices = @transform_1, window_bounds = array<i64: 40, 16>}, {pipeline_mode = #tpu.pipeline_mode<synchronous>, transform_indices = @transform_2, window_bounds = array<i64: 40, 1>}, {pipeline_mode = #tpu.pipeline_mode<synchronous>, transform_indices = @transform_3, window_bounds = array<i64: 8, 72>}, {pipeline_mode = #tpu.pipeline_mode<synchronous>, transform_indices = @transform_4, window_bounds = array<i64: 8, 1>}, {pipeline_mode = #tpu.pipeline_mode<synchronous>, transform_indices = @transform_5, window_bounds = array<i64: 32, 8>}, {pipeline_mode = #tpu.pipeline_mode<synchronous>, transform_indices = @transform_6, window_bounds = array<i64: 32, 1>}, {pipeline_mode = #tpu.pipeline_mode<synchronous>, transform_indices = @transform_7, window_bounds = array<i64: 9, 256>}, {transform_indices = @transform_8, window_bounds = array<i64: 2, 32, 256>}]} {
    %c0 = arith.constant 0 : index
    %c0_0 = arith.constant 0 : index
    %0 = vector.load %arg2[%c0, %c0_0] : memref<40x16xbf16, #tpu.memory_space<vmem>>, vector<40x16xbf16>
    %c0_1 = arith.constant 0 : index
    %c0_2 = arith.constant 0 : index
    %1 = vector.load %arg3[%c0_1, %c0_2] : memref<40x1xf32, #tpu.memory_space<vmem>>, vector<40x1xf32>
    %c0_3 = arith.constant 0 : index
    %c0_4 = arith.constant 0 : index
    %2 = vector.load %arg4[%c0_3, %c0_4] : memref<8x72xbf16, #tpu.memory_space<vmem>>, vector<8x72xbf16>
    %c0_5 = arith.constant 0 : index
    %c0_6 = arith.constant 0 : index
    %3 = vector.load %arg5[%c0_5, %c0_6] : memref<8x1xf32, #tpu.memory_space<vmem>>, vector<8x1xf32>
    %c0_7 = arith.constant 0 : index
    %c0_8 = arith.constant 0 : index
    %4 = vector.load %arg6[%c0_7, %c0_8] : memref<32x8xbf16, #tpu.memory_space<vmem>>, vector<32x8xbf16>
    %c0_9 = arith.constant 0 : index
    %c0_10 = arith.constant 0 : index
    %5 = vector.load %arg7[%c0_9, %c0_10] : memref<32x1xf32, #tpu.memory_space<vmem>>, vector<32x1xf32>
    %c0_11 = arith.constant 0 : index
    %c0_12 = arith.constant 0 : index
    %6 = vector.load %arg8[%c0_11, %c0_12] : memref<9x256xf32, #tpu.memory_space<vmem>>, vector<9x256xf32>
    %7 = vector.extract_strided_slice %6 {offsets = [0, 0], sizes = [1, 256], strides = [1, 1]} : vector<9x256xf32> to vector<1x256xf32>
    %8 = vector.extract_strided_slice %6 {offsets = [1, 0], sizes = [1, 256], strides = [1, 1]} : vector<9x256xf32> to vector<1x256xf32>
    %9 = vector.extract_strided_slice %6 {offsets = [2, 0], sizes = [1, 256], strides = [1, 1]} : vector<9x256xf32> to vector<1x256xf32>
    %10 = vector.extract_strided_slice %6 {offsets = [3, 0], sizes = [1, 256], strides = [1, 1]} : vector<9x256xf32> to vector<1x256xf32>
    %11 = vector.extract_strided_slice %6 {offsets = [5, 0], sizes = [1, 256], strides = [1, 1]} : vector<9x256xf32> to vector<1x256xf32>
    %12 = vector.extract_strided_slice %6 {offsets = [6, 0], sizes = [1, 256], strides = [1, 1]} : vector<9x256xf32> to vector<1x256xf32>
    %13 = vector.extract_strided_slice %6 {offsets = [7, 0], sizes = [1, 256], strides = [1, 1]} : vector<9x256xf32> to vector<1x256xf32>
    %14 = vector.extract_strided_slice %6 {offsets = [8, 0], sizes = [1, 256], strides = [1, 1]} : vector<9x256xf32> to vector<1x256xf32>
    %c0_13 = arith.constant 0 : index
    %c0_14 = arith.constant 0 : index
    %c0_15 = arith.constant 0 : index
    %15 = vector.load %arg1[%c0_13, %c0_14, %c0_15] : memref<2x16x256xbf16, #tpu.memory_space<vmem>>, vector<1x16x256xbf16>
    %16 = vector.shape_cast %15 : vector<1x16x256xbf16> to vector<16x256xbf16>
    %cst = arith.constant dense<0.000000e+00> : vector<40x256xf32>
    %17 = tpu.matmul %0, %16, %cst {dimension_numbers = #tpu.dot_dimension_numbers<[1], [0], [0], [1], [0, 0, 1, 1], [], []>} : vector<40x16xbf16>, vector<16x256xbf16>, vector<40x256xf32> -> vector<40x256xf32>
    %18 = vector.broadcast %1 : vector<40x1xf32> to vector<40x256xf32>
    %19 = arith.addf %17, %18 : vector<40x256xf32>
    %20 = vector.extract_strided_slice %19 {offsets = [0, 0], sizes = [8, 256], strides = [1, 1]} : vector<40x256xf32> to vector<8x256xf32>
    %cst_16 = arith.constant 0.000000e+00 : f32
    %21 = vector.broadcast %cst_16 : f32 to vector<8x256xf32>
    %22 = arith.maximumf %20, %21 : vector<8x256xf32>
    %23 = vector.extract_strided_slice %19 {offsets = [8, 0], sizes = [32, 256], strides = [1, 1]} : vector<40x256xf32> to vector<32x256xf32>
    %c34_i32 = arith.constant 34 : i32
    %24 = tpu.dynamic_rotate %22 by %c34_i32 dim 1 : vector<8x256xf32>, i32 -> vector<8x256xf32>
    %25 = vector.broadcast %7 : vector<1x256xf32> to vector<8x256xf32>
    %26 = arith.mulf %24, %25 : vector<8x256xf32>
    %c32_i32 = arith.constant 32 : i32
    %27 = tpu.dynamic_rotate %22 by %c32_i32 dim 1 : vector<8x256xf32>, i32 -> vector<8x256xf32>
    %28 = vector.broadcast %8 : vector<1x256xf32> to vector<8x256xf32>
    %29 = arith.mulf %27, %28 : vector<8x256xf32>
    %c30_i32 = arith.constant 30 : i32
    %30 = tpu.dynamic_rotate %22 by %c30_i32 dim 1 : vector<8x256xf32>, i32 -> vector<8x256xf32>
    %31 = vector.broadcast %9 : vector<1x256xf32> to vector<8x256xf32>
    %32 = arith.mulf %30, %31 : vector<8x256xf32>
    %c2_i32 = arith.constant 2 : i32
    %33 = tpu.dynamic_rotate %22 by %c2_i32 dim 1 : vector<8x256xf32>, i32 -> vector<8x256xf32>
    %34 = vector.broadcast %10 : vector<1x256xf32> to vector<8x256xf32>
    %35 = arith.mulf %33, %34 : vector<8x256xf32>
    %c254_i32 = arith.constant 254 : i32
    %36 = tpu.dynamic_rotate %22 by %c254_i32 dim 1 : vector<8x256xf32>, i32 -> vector<8x256xf32>
    %37 = vector.broadcast %11 : vector<1x256xf32> to vector<8x256xf32>
    %38 = arith.mulf %36, %37 : vector<8x256xf32>
    %c226_i32 = arith.constant 226 : i32
    %39 = tpu.dynamic_rotate %22 by %c226_i32 dim 1 : vector<8x256xf32>, i32 -> vector<8x256xf32>
    %40 = vector.broadcast %12 : vector<1x256xf32> to vector<8x256xf32>
    %41 = arith.mulf %39, %40 : vector<8x256xf32>
    %c224_i32 = arith.constant 224 : i32
    %42 = tpu.dynamic_rotate %22 by %c224_i32 dim 1 : vector<8x256xf32>, i32 -> vector<8x256xf32>
    %43 = vector.broadcast %13 : vector<1x256xf32> to vector<8x256xf32>
    %44 = arith.mulf %42, %43 : vector<8x256xf32>
    %c222_i32 = arith.constant 222 : i32
    %45 = tpu.dynamic_rotate %22 by %c222_i32 dim 1 : vector<8x256xf32>, i32 -> vector<8x256xf32>
    %46 = vector.broadcast %14 : vector<1x256xf32> to vector<8x256xf32>
    %47 = arith.mulf %45, %46 : vector<8x256xf32>
    %48 = tpu.concatenate %26, %29, %32, %35, %22, %38, %41, %44, %47 in 0 : vector<8x256xf32>, vector<8x256xf32>, vector<8x256xf32>, vector<8x256xf32>, vector<8x256xf32>, vector<8x256xf32>, vector<8x256xf32>, vector<8x256xf32>, vector<8x256xf32> -> vector<72x256xf32>
    %49 = arith.truncf %48 : vector<72x256xf32> to vector<72x256xbf16>
    %cst_17 = arith.constant dense<0.000000e+00> : vector<8x256xf32>
    %50 = tpu.matmul %2, %49, %cst_17 {dimension_numbers = #tpu.dot_dimension_numbers<[1], [0], [0], [1], [0, 0, 1, 1], [], []>} : vector<8x72xbf16>, vector<72x256xbf16>, vector<8x256xf32> -> vector<8x256xf32>
    %51 = vector.broadcast %3 : vector<8x1xf32> to vector<8x256xf32>
    %52 = arith.addf %50, %51 : vector<8x256xf32>
    %cst_18 = arith.constant 0.000000e+00 : f32
    %53 = vector.broadcast %cst_18 : f32 to vector<8x256xf32>
    %54 = arith.maximumf %52, %53 : vector<8x256xf32>
    %55 = arith.truncf %54 : vector<8x256xf32> to vector<8x256xbf16>
    %cst_19 = arith.constant dense<0.000000e+00> : vector<32x256xf32>
    %56 = tpu.matmul %4, %55, %cst_19 {dimension_numbers = #tpu.dot_dimension_numbers<[1], [0], [0], [1], [0, 0, 1, 1], [], []>} : vector<32x8xbf16>, vector<8x256xbf16>, vector<32x256xf32> -> vector<32x256xf32>
    %57 = vector.broadcast %5 : vector<32x1xf32> to vector<32x256xf32>
    %58 = arith.addf %56, %57 : vector<32x256xf32>
    %59 = arith.addf %58, %23 : vector<32x256xf32>
    %cst_20 = arith.constant 0.000000e+00 : f32
    %60 = vector.broadcast %cst_20 : f32 to vector<32x256xf32>
    %61 = arith.maximumf %59, %60 : vector<32x256xf32>
    %c0_21 = arith.constant 0 : index
    %c0_22 = arith.constant 0 : index
    %c0_23 = arith.constant 0 : index
    %62 = vector.load %arg9[%c0_21, %c0_22, %c0_23] : memref<2x32x256xf32, #tpu.memory_space<vmem>>, vector<1x32x256xf32>
    %63 = vector.shape_cast %62 : vector<1x32x256xf32> to vector<32x256xf32>
    %64 = vector.shape_cast %61 : vector<32x256xf32> to vector<1x32x256xf32>
    tpu.vector_store %arg9[%c0_21, %c0_22, %c0_23], %64 {strides = array<i32>} : memref<2x32x256xf32, #tpu.memory_space<vmem>>, vector<1x32x256xf32>,
    %c1 = arith.constant 1 : index
    %c0_24 = arith.constant 0 : index
    %c0_25 = arith.constant 0 : index
    %65 = vector.load %arg1[%c1, %c0_24, %c0_25] : memref<2x16x256xbf16, #tpu.memory_space<vmem>>, vector<1x16x256xbf16>
    %66 = vector.shape_cast %65 : vector<1x16x256xbf16> to vector<16x256xbf16>
    %cst_26 = arith.constant dense<0.000000e+00> : vector<40x256xf32>
    %67 = tpu.matmul %0, %66, %cst_26 {dimension_numbers = #tpu.dot_dimension_numbers<[1], [0], [0], [1], [0, 0, 1, 1], [], []>} : vector<40x16xbf16>, vector<16x256xbf16>, vector<40x256xf32> -> vector<40x256xf32>
    %68 = vector.broadcast %1 : vector<40x1xf32> to vector<40x256xf32>
    %69 = arith.addf %67, %68 : vector<40x256xf32>
    %70 = vector.extract_strided_slice %69 {offsets = [0, 0], sizes = [8, 256], strides = [1, 1]} : vector<40x256xf32> to vector<8x256xf32>
    %cst_27 = arith.constant 0.000000e+00 : f32
    %71 = vector.broadcast %cst_27 : f32 to vector<8x256xf32>
    %72 = arith.maximumf %70, %71 : vector<8x256xf32>
    %73 = vector.extract_strided_slice %69 {offsets = [8, 0], sizes = [32, 256], strides = [1, 1]} : vector<40x256xf32> to vector<32x256xf32>
    %c34_i32_28 = arith.constant 34 : i32
    %74 = tpu.dynamic_rotate %72 by %c34_i32_28 dim 1 : vector<8x256xf32>, i32 -> vector<8x256xf32>
    %75 = vector.broadcast %7 : vector<1x256xf32> to vector<8x256xf32>
    %76 = arith.mulf %74, %75 : vector<8x256xf32>
    %c32_i32_29 = arith.constant 32 : i32
    %77 = tpu.dynamic_rotate %72 by %c32_i32_29 dim 1 : vector<8x256xf32>, i32 -> vector<8x256xf32>
    %78 = vector.broadcast %8 : vector<1x256xf32> to vector<8x256xf32>
    %79 = arith.mulf %77, %78 : vector<8x256xf32>
    %c30_i32_30 = arith.constant 30 : i32
    %80 = tpu.dynamic_rotate %72 by %c30_i32_30 dim 1 : vector<8x256xf32>, i32 -> vector<8x256xf32>
    %81 = vector.broadcast %9 : vector<1x256xf32> to vector<8x256xf32>
    %82 = arith.mulf %80, %81 : vector<8x256xf32>
    %c2_i32_31 = arith.constant 2 : i32
    %83 = tpu.dynamic_rotate %72 by %c2_i32_31 dim 1 : vector<8x256xf32>, i32 -> vector<8x256xf32>
    %84 = vector.broadcast %10 : vector<1x256xf32> to vector<8x256xf32>
    %85 = arith.mulf %83, %84 : vector<8x256xf32>
    %c254_i32_32 = arith.constant 254 : i32
    %86 = tpu.dynamic_rotate %72 by %c254_i32_32 dim 1 : vector<8x256xf32>, i32 -> vector<8x256xf32>
    %87 = vector.broadcast %11 : vector<1x256xf32> to vector<8x256xf32>
    %88 = arith.mulf %86, %87 : vector<8x256xf32>
    %c226_i32_33 = arith.constant 226 : i32
    %89 = tpu.dynamic_rotate %72 by %c226_i32_33 dim 1 : vector<8x256xf32>, i32 -> vector<8x256xf32>
    %90 = vector.broadcast %12 : vector<1x256xf32> to vector<8x256xf32>
    %91 = arith.mulf %89, %90 : vector<8x256xf32>
    %c224_i32_34 = arith.constant 224 : i32
    %92 = tpu.dynamic_rotate %72 by %c224_i32_34 dim 1 : vector<8x256xf32>, i32 -> vector<8x256xf32>
    %93 = vector.broadcast %13 : vector<1x256xf32> to vector<8x256xf32>
    %94 = arith.mulf %92, %93 : vector<8x256xf32>
    %c222_i32_35 = arith.constant 222 : i32
    %95 = tpu.dynamic_rotate %72 by %c222_i32_35 dim 1 : vector<8x256xf32>, i32 -> vector<8x256xf32>
    %96 = vector.broadcast %14 : vector<1x256xf32> to vector<8x256xf32>
    %97 = arith.mulf %95, %96 : vector<8x256xf32>
    %98 = tpu.concatenate %76, %79, %82, %85, %72, %88, %91, %94, %97 in 0 : vector<8x256xf32>, vector<8x256xf32>, vector<8x256xf32>, vector<8x256xf32>, vector<8x256xf32>, vector<8x256xf32>, vector<8x256xf32>, vector<8x256xf32>, vector<8x256xf32> -> vector<72x256xf32>
    %99 = arith.truncf %98 : vector<72x256xf32> to vector<72x256xbf16>
    %cst_36 = arith.constant dense<0.000000e+00> : vector<8x256xf32>
    %100 = tpu.matmul %2, %99, %cst_36 {dimension_numbers = #tpu.dot_dimension_numbers<[1], [0], [0], [1], [0, 0, 1, 1], [], []>} : vector<8x72xbf16>, vector<72x256xbf16>, vector<8x256xf32> -> vector<8x256xf32>
    %101 = vector.broadcast %3 : vector<8x1xf32> to vector<8x256xf32>
    %102 = arith.addf %100, %101 : vector<8x256xf32>
    %cst_37 = arith.constant 0.000000e+00 : f32
    %103 = vector.broadcast %cst_37 : f32 to vector<8x256xf32>
    %104 = arith.maximumf %102, %103 : vector<8x256xf32>
    %105 = arith.truncf %104 : vector<8x256xf32> to vector<8x256xbf16>
    %cst_38 = arith.constant dense<0.000000e+00> : vector<32x256xf32>
    %106 = tpu.matmul %4, %105, %cst_38 {dimension_numbers = #tpu.dot_dimension_numbers<[1], [0], [0], [1], [0, 0, 1, 1], [], []>} : vector<32x8xbf16>, vector<8x256xbf16>, vector<32x256xf32> -> vector<32x256xf32>
    %107 = vector.broadcast %5 : vector<32x1xf32> to vector<32x256xf32>
    %108 = arith.addf %106, %107 : vector<32x256xf32>
    %109 = arith.addf %108, %73 : vector<32x256xf32>
    %cst_39 = arith.constant 0.000000e+00 : f32
    %110 = vector.broadcast %cst_39 : f32 to vector<32x256xf32>
    %111 = arith.maximumf %109, %110 : vector<32x256xf32>
    %c1_40 = arith.constant 1 : index
    %c0_41 = arith.constant 0 : index
    %c0_42 = arith.constant 0 : index
    %112 = vector.load %arg9[%c1_40, %c0_41, %c0_42] : memref<2x32x256xf32, #tpu.memory_space<vmem>>, vector<1x32x256xf32>
    %113 = vector.shape_cast %112 : vector<1x32x256xf32> to vector<32x256xf32>
    %114 = vector.shape_cast %111 : vector<32x256xf32> to vector<1x32x256xf32>
    tpu.vector_store %arg9[%c1_40, %c0_41, %c0_42], %114 {strides = array<i32>} : memref<2x32x256xf32, #tpu.memory_space<vmem>>, vector<1x32x256xf32>,
    return
  }
  func.func @transform_0(%arg0: i32) -> (i32, i32, i32) {
    %c0_i32 = arith.constant 0 : i32
    %c0_i32_0 = arith.constant 0 : i32
    %c0_i32_1 = arith.constant 0 : i32
    return %arg0, %c0_i32, %c0_i32_0 : i32, i32, i32
  }
  func.func @transform_1(%arg0: i32) -> (i32, i32) {
    %c0_i32 = arith.constant 0 : i32
    %c0_i32_0 = arith.constant 0 : i32
    %c0_i32_1 = arith.constant 0 : i32
    return %c0_i32, %c0_i32_0 : i32, i32
  }
  func.func @transform_2(%arg0: i32) -> (i32, i32) {
    %c0_i32 = arith.constant 0 : i32
    %c0_i32_0 = arith.constant 0 : i32
    %c0_i32_1 = arith.constant 0 : i32
    return %c0_i32, %c0_i32_0 : i32, i32
  }
  func.func @transform_3(%arg0: i32) -> (i32, i32) {
    %c0_i32 = arith.constant 0 : i32
    %c0_i32_0 = arith.constant 0 : i32
    %c0_i32_1 = arith.constant 0 : i32
    return %c0_i32, %c0_i32_0 : i32, i32
  }
  func.func @transform_4(%arg0: i32) -> (i32, i32) {
    %c0_i32 = arith.constant 0 : i32
    %c0_i32_0 = arith.constant 0 : i32
    %c0_i32_1 = arith.constant 0 : i32
    return %c0_i32, %c0_i32_0 : i32, i32
  }
  func.func @transform_5(%arg0: i32) -> (i32, i32) {
    %c0_i32 = arith.constant 0 : i32
    %c0_i32_0 = arith.constant 0 : i32
    %c0_i32_1 = arith.constant 0 : i32
    return %c0_i32, %c0_i32_0 : i32, i32
  }
  func.func @transform_6(%arg0: i32) -> (i32, i32) {
    %c0_i32 = arith.constant 0 : i32
    %c0_i32_0 = arith.constant 0 : i32
    %c0_i32_1 = arith.constant 0 : i32
    return %c0_i32, %c0_i32_0 : i32, i32
  }
  func.func @transform_7(%arg0: i32) -> (i32, i32) {
    %c0_i32 = arith.constant 0 : i32
    %c0_i32_0 = arith.constant 0 : i32
    %c0_i32_1 = arith.constant 0 : i32
    return %c0_i32, %c0_i32_0 : i32, i32
  }
  func.func @transform_8(%arg0: i32) -> (i32, i32, i32) {
    %c0_i32 = arith.constant 0 : i32
    %c0_i32_0 = arith.constant 0 : i32
    %c0_i32_1 = arith.constant 0 : i32
    return %arg0, %c0_i32, %c0_i32_0 : i32, i32, i32
  }
}

</mosaic_0001>

<bundles_post_ra>
// kernel: tpu_custom_call.1
= control target key start
LH: loop header
LB: loop body
LE: loop exit
PB: predicated region body
PF: predicated region fallthrough
CT: control target
= control target key end

     0   :  { %13 = vsyncpa [#allocation3], 0  ;;  %s1860_s0 = inlined_call_operand.vmem [shape: bf16[4,16,256], index: 0, kind: input, shape index: {}]   ;;  %s1861_s1 = inlined_call_operand.vmem [shape: bf16[40,16], index: 1, kind: input, shape index: {}]   ;;  %s1862_s2 = inlined_call_operand.vmem [shape: f32[40,1], index: 2, kind: input, shape index: {}]   ;;  %s1863_s3 = inlined_call_operand.vmem [shape: bf16[8,72], index: 3, kind: input, shape index: {}]   ;;  %s1864_s4 = inlined_call_operand.vmem [shape: f32[8,1], index: 4, kind: input, shape index: {}]   ;;  %s1865_s5 = inlined_call_operand.vmem [shape: bf16[32,8], index: 5, kind: input, shape index: {}]   ;;  %s1866_s6 = inlined_call_operand.vmem [shape: f32[32,1], index: 6, kind: input, shape index: {}]   ;;  %s1867_s7 = inlined_call_operand.vmem [shape: f32[9,256], index: 7, kind: input, shape index: {}]   ;;  %s1868_s8 = inlined_call_operand.hbm [shape: f32[4,32,256], index: 8, kind: output, shape index: {}]  }
   0x1   :  { %15 = vsyncpa [#allocation3 + $0x1], 0  ;;  %s1385_s27 = smov 0   ;;  %s1387_s28 = smov 0  }
   0x2   :  { %s1389_s29 = smov 0   ;;  %s1391_s30 = smov 0  }
   0x3 LB: > { %s1406_s9 = sadd.s32 4294967295, %s1326_s30   ;;  %s1149_s10 = sadd.s32 4294967294, %s1326_s30   ;;  %s1326_s30 = sphi %s1391_s30, %s1874_s30   ;;  %s1322_s29 = sphi %s1389_s29, %s1873_s29   ;;  %s1318_s28 = sphi %s1387_s28, %s1872_s28   ;;  %s1314_s27 = sphi %s1385_s27, %s1871_s27  }
   0x4   : > { %s1410_s11 = sadd.s32 1, %s1326_s30   ;;  %s201_s12 = sadd.s32 1, %s1322_s29 }
   0x5   : > { %s198_s13 = ssub.s32 %s1326_s30, %s1410_s11  ;;  %p211_p0 = scmp.ne.s32.totalorder %s1322_s29, %s1318_s28 }
   0x6   : > { %p199_p1 = scmp.eq.s32.totalorder %s198_s13, 0  ;;  %p212_p2 = scmp.eq.s32.totalorder %s1406_s9, 1 }
   0x7   : > { %p217_p3 = scmp.ne.s32.totalorder %s1318_s28, %s1314_s27  ;;  %p218_p4 = scmp.eq.s32.totalorder %s1149_s10, 1 }
   0x8   : > { %s1421_s14 = scalar_select %p199_p1, %s1322_s29, %s201_s12  }
   0x9   : > { %p1423_p5 = por %p212_p2, %p211_p0  ;;  %p1427_p6 = por %p218_p4, %p217_p3 }
   0xa   : > { %p1152_p7 = scmp.ge.s32.totalorder %s1326_s30, 1  ;;  %p267_p8 = scmp.lt.s32.totalorder %s1326_s30, 3 }
   0xc   : > { %p268_p9 = pnand %p1152_p7, %p267_p8 }
   0xd   : > { %s1154_s17 = sshll.u32 (!%p268_p9), %s1406_s9, 1  ;;  %s1329_s12 = smov (!%p268_p9), 94  }
   0xe   : > { %271 = sbr.rel (%p268_p9) target bundleno = 840 (0x348), region = 52  ;;  %p303_p10 = scmp.lt.s32.totalorder (!%p268_p9), %s1154_s17, 3 }
   0xf   : > { %s1330_s13 = smov (!%p268_p9), 98   ;;  %s1332_s18 = smov (!%p268_p9), 126  }
  0x10   : > { %s1333_s19 = smov (!%p268_p9), 30   ;;  %s1336_s24 = smov (!%p268_p9), 32  }
  0x11   : > { %s1202_s21 = sshll.u32 (!%p268_p9), %s1406_s9, 11  ;;  %s1337_s10 = smov (!%p268_p9), [#allocation2]  }
  0x12   : > { %s1810_s25 = scalar_lea.hbm (!%p268_p9), %s1868_s8, %s1202_s21 }
  0x13   : > { %v1328_v0 = vmov 0   ;;  %v316_v1 = vld [vmem:[%s1862_s2] sm:$0xff]  ;;  %s1876_s17 = smov (!%p303_p10, %s1154_s17), 3  ;;  %vm385_vm0 = vcmask 130048   ;;  %v1262_v7 = vld [vmem:[%s1861_s1 + $0x8] sm:$0xff]   ;;  %v319_v23 = vld [vmem:[%s1862_s2 + $0x18] sm:$0xff]  ;;  %v462_v31 = vlaneseq }
  0x14   : > { %427 = vmatprep.mubr.bf16.mxu0 %v1328_v0  ;;  %832 = vmatprep.mubr.bf16.mxu1 %v1328_v0  ;;  %s1200_s20 = sshll.u32 %s1876_s17, 4  ;;  %v1261_v6 = vld [vmem:[%s1861_s1] sm:$0xff]   ;;  %s1331_s17 = smov 96   ;;  %v1263_v21 = vld [vmem:[%s1861_s1 + $0x10] ss:$0 sps:$4 sm:$0xff]   ;;  %v317_v22 = vld [vmem:[%s1862_s2 + $0x8] sm:$0xff] }
  0x15   : > { %1253 = vset.pattern.permute.xlu0 %v1328_v0  ;;  %1254 = vset.pattern.permute.xlu1 %v1328_v0  ;;  %s307_s23 = scalar_lea.vmem %s1860_s0, %s1200_s20  ;;  %s1334_s20 = smov 2   ;;  %v327_v24 = vld [vmem:[%s1866_s6] sm:$0xff]  ;;  %v329_v26 = vld [vmem:[%s1866_s6 + $0x10] sm:$0xff]  ;;  %v328_v29 = vld [vmem:[%s1866_s6 + $0x8] sm:$0xff]  ;;  %v1536_v32 = vand.u32 127, %v462_v31  ;;  %vm615_vm2 = vcmask 1043456  }
  0x16   : > { %339 = vperm.xlu0 %1253, %v316_v1   ;;  %v1255_v2 = vld [vmem:[%s307_s23 + $0x4] ss:$8 sps:$4 sm:$0xff]   ;;  %v1257_v3 = vld [vmem:[%s307_s23 + $0x14] ss:$8 sps:$4 sm:$0xff]   ;;  %v1259_v4 = vld [vmem:[%s307_s23] ss:$8 sps:$4 sm:$0xff]  }
  0x17   : > { %409 = vmatprep.subr.bf16.mxu0 %v1255_v2  ;;  %v1260_v5 = vld [vmem:[%s307_s23 + $0x10] ss:$8 sps:$4 sm:$0xff]   ;;  %814 = vmatprep.subr.bf16.mxu1 %v1257_v3  ;;  %s1335_s23 = smov 34   ;;  %v322_v25 = vld [vmem:[%s1864_s4] sm:$0xff]  ;;  %vm583_vm1 = vcmp.lt.s32.totalorder %v1536_v32, 94  ;;  %v1565_v48 = vshrl.u32 %v462_v31, 7 }
  0x18   : > { %410 = vmatpush1.bf16.msra.mxu0 %v1259_v4  ;;  %815 = vmatpush1.bf16.msra.mxu1 %v1260_v5  ;;  %v318_v27 = vld [vmem:[%s1862_s2 + $0x10] sm:$0xff]  ;;  %v320_v28 = vld [vmem:[%s1862_s2 + $0x20] sm:$0xff]  ;;  %v330_v30 = vld [vmem:[%s1866_s6 + $0x18] sm:$0xff]  ;;  %vm549_vm3 = vcmp.lt.s32.totalorder %v1536_v32, 98  ;;  %vm566_vm4 = vcmp.lt.s32.totalorder %v1536_v32, 96  ;;  %vm532_vm5 = vcmp.lt.s32.totalorder %v1536_v32, 126 }
  0x19   : > { %v1544_v35 = vld [vmem:[%s1867_s7 + $0x10] ss:$0 sm:$0xff]  ;;  %v1549_v36 = vld [vmem:[%s1867_s7 + $0x18] ss:$0 sm:$0xff]  ;;  %v554_v51 = vsub.s32 6, %v1565_v48  ;;  %v1571_v52 = vld [vmem:[%s1867_s7] sm:$0xff] }
  0x1a   : > { %v571_v53 = vsub.s32 7, %v1565_v48  ;;  %v1577_v56 = vld [vmem:[%s1867_s7 + $0x8] sm:$0xff]  ;;  %v503_v31 = vsub.s32 2, %v1565_v48  ;;  %vm498_vm6 = vcmp.lt.s32.totalorder %v1536_v32, 30  ;;  %vm515_vm7 = vcmp.lt.s32.totalorder %v1536_v32, 2 }
  0x1b   : > { %1162 = vmatmul.mubr.msk.bf16.vlgmr.msra.gmra.mxu0 %vm385_vm0, %v1261_v6  ;;  %1178 = vmatmul.mubr.msk.bf16.vlgmr.msra.gmra.mxu1 %vm385_vm0, %v1261_v6  ;;  %v1581_v57 = vrot.slane %v1571_v52, %v554_v51  ;;  %v1588_v60 = vrot.slane %v1577_v56, %v554_v51  ;;  %vm481_vm8 = vcmp.lt.s32.totalorder %v1536_v32, 32  ;;  %vm464_vm9 = vcmp.lt.s32.totalorder %v1536_v32, 34 }
  0x1c   : > { %437 = vmatprep.mubr.bf16.mxu0 %v1328_v0  ;;  %842 = vmatprep.mubr.bf16.mxu1 %v1328_v0  ;;  %v1592_v61 = vrot.slane %v1571_v52, %v571_v53  ;;  %v576_v62 = vrot.slane %v1577_v56, %v571_v53  ;;  %vm611_vm10 = vcmask 588800   ;;  %vm697_vm11 = vcmask 64512  }
  0x23   : > { %1163 = vmatmul.mubr.msk.bf16.gmra.mxu0 %vm385_vm0, %v1262_v7  ;;  %1179 = vmatmul.mubr.msk.bf16.gmra.mxu1 %vm385_vm0, %v1262_v7 }
  0x24   : > { %447 = vmatprep.mubr.bf16.mxu0 %v1328_v0  ;;  %852 = vmatprep.mubr.bf16.mxu1 %v1328_v0 }
  0x2b   : > { %1164 = vmatmul.mubr.msk.bf16.gmra.mxu0 %vm385_vm0, %v1263_v21  ;;  %1180 = vmatmul.mubr.msk.bf16.gmra.mxu1 %vm385_vm0, %v1263_v21 }
  0x2c   : > { %654 = vmatprep.mubr.bf16.mxu0 %v1328_v0  ;;  %975 = vmatprep.mubr.bf16.mxu1 %v1328_v0 }
  0x91   : > { %v340_v8 = vpop.permute.xlu0 %339 }
  0xdb   : > { %v429_v9 = vpop.f32.mrf.mxu0  ;;  %v834_v10 = vpop.f32.mrf.mxu1 }
  0xdc   : > { %v430_v11 = vadd.f32 %v429_v9, %v340_v8  ;;  %v835_v12 = vadd.f32 %v834_v10, %v340_v8  ;;  %v537_v10 = vsub.s32 5, %v1565_v48 }
  0xdd   : > { %v836_v13 = vpop.f32.mrf.mxu1  ;;  %v431_v17 = vpop.f32.mrf.mxu0 }
  0xde   : > { %v1458_v14 = vmax.f32 %v430_v11, 0.0  ;;  %v1460_v15 = vmax.f32 %v835_v12, 0.0  ;;  %v837_v16 = vadd.f32 %v836_v13, %v340_v8  ;;  %v432_v18 = vadd.f32 %v431_v17, %v340_v8 }
  0xdf   : > { %v1607_v13 = vrot.slane %v1571_v52, %v537_v10  ;;  %v1722_v32 = vpop.f32.mrf.mxu0 }
  0xe0   : > { %919 = vrot.lane.b32.xlu1 %v1460_v15, %s1329_s12  ;;  %579 = vrot.lane.b32.xlu0 %v1458_v14, %s1329_s12  ;;  %v1466_v19 = vmax.f32 %v837_v16, 0.0  ;;  %v1471_v20 = vmax.f32 %v432_v18, 0.0  ;;  %v542_v16 = vrot.slane %v1577_v56, %v537_v10 }
  0xe4   : > { %545 = vrot.lane.b32.xlu1 %v1458_v14, %s1330_s13  ;;  %921 = vrot.lane.b32.xlu0 %v1466_v19, %s1329_s12 }
  0xe8   : > { %562 = vrot.lane.b32.xlu1 %v1458_v14, %s1331_s17  ;;  %547 = vrot.lane.b32.xlu0 %v1471_v20, %s1330_s13 }
  0xec   : > { %903 = vrot.lane.b32.xlu1 %v1460_v15, %s1330_s13  ;;  %564 = vrot.lane.b32.xlu0 %v1471_v20, %s1331_s17 }
  0xf0   : > { %911 = vrot.lane.b32.xlu1 %v1460_v15, %s1331_s17  ;;  %905 = vrot.lane.b32.xlu0 %v1466_v19, %s1330_s13 }
  0xf4   : > { %528 = vrot.lane.b32.xlu1 %v1458_v14, %s1332_s18  ;;  %913 = vrot.lane.b32.xlu0 %v1466_v19, %s1331_s17 }
  0xf8   : > { %895 = vrot.lane.b32.xlu1 %v1460_v15, %s1332_s18  ;;  %530 = vrot.lane.b32.xlu0 %v1471_v20, %s1332_s18 }
  0xfc   : > { %494 = vrot.lane.b32.xlu1 %v1458_v14, %s1333_s19  ;;  %897 = vrot.lane.b32.xlu0 %v1466_v19, %s1332_s18  ;;  %s299_s18 = sand.u32 1, %s1318_s28  }
  0xfd   : > { %s1820_s9 = scalar_lea.sflag [#allocation3], %s299_s18 }
 0x100   : > { %511 = vrot.lane.b32.xlu1 %v1458_v14, %s1334_s20  ;;  %496 = vrot.lane.b32.xlu0 %v1471_v20, %s1333_s19 }
 0x104   : > { %879 = vrot.lane.b32.xlu1 %v1460_v15, %s1333_s19  ;;  %513 = vrot.lane.b32.xlu0 %v1471_v20, %s1334_s20 }
 0x108   : > { %887 = vrot.lane.b32.xlu1 %v1460_v15, %s1334_s20  ;;  %881 = vrot.lane.b32.xlu0 %v1466_v19, %s1333_s19  ;;  %s1153_s19 = sshll.u32 %s299_s18, 7 }
 0x10c   : > { %581 = vrot.lane.b32.xlu1 %v1471_v20, %s1329_s12  ;;  %889 = vrot.lane.b32.xlu0 %v1466_v19, %s1334_s20  ;;  %s1779_s20 = scalar_lea.vmem [#allocation2], %s1153_s19  ;;  %s1270_s12 = sshll.u32 %s1337_s10, 4  ;;  %s1271_s12 = int_to_ptr.vmem [resolvable:$false] %s1270_s12 }
 0x10d   : > { %s1087_s22 = sshll.u32 %s1779_s20, 4  ;;  %s1272_s13 = scalar_lea.vmem %s1271_s12, 4096  ;;  %s1812_s22 = int_to_ptr.vmem [resolvable:$true] %s1087_s22 }
 0x10e   : > { %s1266_s26 = scalar_lea.vmem %s1812_s22, 2048  ;;  %p1273_p0 = scmp.lt.s32.totalorder %s1812_s22, %s1271_s12 }
 0x10f   : > { %p1267_p11 = scmp.ne.s32.totalorder %s1812_s22, %s1266_s26  ;;  %p1274_p1 = scmp.lt.s32.totalorder %s1272_s13, %s1266_s26 }
 0x110   : > { %458 = vrot.lane.b32.xlu1 %v1458_v14, %s1335_s23  ;;  %460 = vrot.lane.b32.xlu0 %v1471_v20, %s1335_s23 }
 0x111   : > { %p1268_p12 = pnand %p1267_p11, %p1423_p5  ;;  %p1275_p2 = por %p1274_p1, %p1273_p0 }
 0x113   : > { %p1269_p13 = pneg %p1268_p12 }
 0x114   : > { %477 = vrot.lane.b32.xlu1 %v1458_v14, %s1336_s24  ;;  %479 = vrot.lane.b32.xlu0 %v1471_v20, %s1336_s24 }
 0x115   : > { %p1276_p3 = pnand %p1275_p2, %p1269_p13 }
 0x118   : > { %863 = vrot.lane.b32.xlu1 %v1460_v15, %s1335_s23  ;;  %865 = vrot.lane.b32.xlu0 %v1466_v19, %s1335_s23 }
 0x11c   : > { %871 = vrot.lane.b32.xlu1 %v1460_v15, %s1336_s24  ;;  %873 = vrot.lane.b32.xlu0 %v1466_v19, %s1336_s24 }
 0x120   : > { %344 = vperm.xlu0 %1253, %v317_v22   ;;  %608 = vperm.xlu1 %1254, %v322_v25  }
 0x124   : > { %354 = vperm.xlu0 %1253, %v319_v23   ;;  %349 = vperm.xlu1 %1254, %v318_v27  }
 0x128   : > { %669 = vperm.xlu0 %1253, %v327_v24   ;;  %359 = vperm.xlu1 %1254, %v320_v28  }
 0x12c   : > { %679 = vperm.xlu0 %1253, %v329_v26   ;;  %674 = vperm.xlu1 %1254, %v328_v29  }
 0x130   : > { %684 = vperm.xlu1 %1254, %v330_v30  }
 0x152   : > { %v920_v33 = vpop.permute.xlu1 %919  ;;  %v1538_v34 = vpop.permute.xlu0 %579 }
 0x156   : > { %v1551_v37 = vpop.permute.xlu1 %545  ;;  %v922_v38 = vpop.permute.xlu0 %921 }
 0x157   : > { %v923_v39 = vsel %vm583_vm1, %v920_v33, %v922_v38  ;;  %v924_v40 = vsel %vm583_vm1, %v922_v38, %v920_v33  ;;  %v520_v33 = vsub.s32 3, %v1565_v48 }
 0x158   : > { %v925_v41 = vmul.f32 %v1544_v35, %v923_v39  ;;  %v926_v42 = vmul.f32 %v1549_v36, %v924_v40 }
 0x15a   : > { %v935_v43 = vpack.c.bf16 %v925_v41, %v925_v41  ;;  %v936_v44 = vpack.c.bf16 %v926_v42, %v926_v42  ;;  %v1559_v45 = vpop.permute.xlu1 %562  ;;  %v1561_v46 = vpop.permute.xlu0 %547  ;;  %v1634_v41 = vrot.slane %v1571_v52, %v503_v31  ;;  %v508_v42 = vrot.slane %v1577_v56, %v503_v31 }
 0x15c   : > { %1181 = vmatprep.subr.msk.bf16.mxu1 %vm615_vm2, %v936_v44  ;;  %v938_v47 = vsel %vm615_vm2, %v935_v43, 0  ;;  %v551_v43 = vsel %vm549_vm3, %v1561_v46, %v1551_v37  ;;  %v521_v44 = vrot.slane %v1571_v52, %v520_v33 }
 0x15d   : > { %950 = vmatpush1.bf16.msra.mxu1 %v938_v47  ;;  %v525_v47 = vrot.slane %v1577_v56, %v520_v33 }
 0x15e   : > { %v904_v49 = vpop.permute.xlu1 %903  ;;  %v565_v50 = vpop.permute.xlu0 %564 }
 0x162   : > { %v912_v54 = vpop.permute.xlu1 %911  ;;  %v906_v55 = vpop.permute.xlu0 %905 }
 0x163   : > { %v907_v58 = vsel %vm549_vm3, %v904_v49, %v906_v55  ;;  %v908_v59 = vsel %vm549_vm3, %v906_v55, %v904_v49  ;;  %v567_v49 = vsel %vm566_vm4, %v1559_v45, %v565_v50 }
 0x164   : > { %v909_v4 = vmul.f32 %v907_v58, %v1581_v57  ;;  %v910_v5 = vmul.f32 %v908_v59, %v1588_v60 }
 0x166   : > { %v1595_v63 = vpop.permute.xlu1 %528  ;;  %v914_v1 = vpop.permute.xlu0 %913 }
 0x167   : > { %v915_v2 = vsel %vm566_vm4, %v912_v54, %v914_v1  ;;  %v916_v3 = vsel %vm566_vm4, %v914_v1, %v912_v54 }
 0x168   : > { %v917_v6 = vmul.f32 %v915_v2, %v1592_v61  ;;  %v918_v7 = vmul.f32 %v916_v3, %v576_v62 }
 0x16a   : > { %v933_v8 = vpack.c.bf16 %v917_v6, %v909_v4  ;;  %v896_v9 = vpop.permute.xlu1 %895  ;;  %v531_v11 = vpop.permute.xlu0 %530  ;;  %v934_v12 = vpack.c.bf16 %v918_v7, %v910_v5  ;;  %v550_v5 = vsel %vm549_vm3, %v1551_v37, %v1561_v46  ;;  %v561_v6 = vmul.f32 %v1588_v60, %v551_v43 }
 0x16b   : > { %v486_v7 = vsub.s32 1, %v1565_v48  ;;  %v533_v37 = vsel %vm532_vm5, %v1595_v63, %v531_v11 }
 0x16c   : > { %951 = vmatprep.subr.bf16.mxu1 %v934_v12 }
 0x16d   : > { %952 = vmatpush1.bf16.msra.mxu1 %v933_v8 }
 0x16e   : > { %v1610_v17 = vpop.permute.xlu1 %494  ;;  %v898_v18 = vpop.permute.xlu0 %897 }
 0x16f   : > { %v899_v21 = vsel %vm532_vm5, %v896_v9, %v898_v18  ;;  %v900_v22 = vsel %vm532_vm5, %v898_v18, %v896_v9  ;;  %v577_v18 = vmul.f32 %v1592_v61, %v567_v49 }
 0x170   : > { %v901_v23 = vmul.f32 %v899_v21, %v1607_v13  ;;  %v902_v24 = vmul.f32 %v900_v22, %v542_v16  ;;  %v560_v22 = vmul.f32 %v1581_v57, %v550_v5  ;;  %v543_v57 = vmul.f32 %v1607_v13, %v533_v37  ;;  %v1724_v5 = vpop.f32.mrf.mxu1 }
 0x172   : > { %v931_v25 = vpack.c.bf16 %v901_v23, %v1460_v15  ;;  %v1618_v26 = vpop.permute.xlu1 %511  ;;  %v1620_v27 = vpop.permute.xlu0 %496  ;;  %v932_v28 = vpack.c.bf16 %v902_v24, %v1466_v19  ;;  %v568_v15 = vsel %vm566_vm4, %v565_v50, %v1559_v45  ;;  %v469_v24 = vsub.s32 0, %v1565_v48 }
 0x173   : > { %v578_v51 = vmul.f32 %v576_v62, %v568_v15  ;;  %v500_v13 = vsel %vm498_vm6, %v1620_v27, %v1610_v17 }
 0x174   : > { %953 = vmatprep.subr.bf16.mxu1 %v932_v28  ;;  %v474_v33 = vrot.slane %v1577_v56, %v469_v24  ;;  %v509_v43 = vmul.f32 %v1634_v41, %v500_v13 }
 0x175   : > { %954 = vmatpush1.bf16.msra.mxu1 %v931_v25  ;;  %v603_v21 = vpack.c.bf16 %v578_v51, %v561_v6  ;;  %v499_v25 = vsel %vm498_vm6, %v1610_v17, %v1620_v27  ;;  %v470_v27 = vrot.slane %v1571_v52, %v469_v24  ;;  %v1726_v6 = vpop.f32.mrf.mxu0 }
 0x176   : > { %v880_v29 = vpop.permute.xlu1 %879  ;;  %v514_v30 = vpop.permute.xlu0 %513 }
 0x177   : > { %v516_v23 = vsel %vm515_vm7, %v1618_v26, %v514_v30  ;;  %v517_v48 = vsel %vm515_vm7, %v514_v30, %v1618_v26 }
 0x178   : > { %v527_v28 = vmul.f32 %v525_v47, %v516_v23 }
 0x17a   : > { %v888_v38 = vpop.permute.xlu1 %887  ;;  %v882_v39 = vpop.permute.xlu0 %881 }
 0x17b   : > { %v883_v40 = vsel %vm498_vm6, %v880_v29, %v882_v39  ;;  %v884_v19 = vsel %vm498_vm6, %v882_v39, %v880_v29  ;;  %v526_v39 = vmul.f32 %v521_v44, %v517_v48 }
 0x17c   : > { %v885_v53 = vmul.f32 %v884_v19, %v1634_v41  ;;  %v886_v54 = vmul.f32 %v883_v40, %v508_v42  ;;  %v600_v40 = vpack.c.bf16 %v543_v57, %v1458_v14 }
 0x17d   : > { %v598_v14 = vpack.c.bf16 %v526_v39, %v509_v43 }
 0x17e   : > { %v582_v55 = vpop.permute.xlu1 %581  ;;  %v890_v58 = vpop.permute.xlu0 %889 }
 0x17f   : > { %v584_v59 = vsel %vm583_vm1, %v1538_v34, %v582_v55  ;;  %v585_v1 = vsel %vm583_vm1, %v582_v55, %v1538_v34  ;;  %v891_v2 = vsel %vm515_vm7, %v888_v38, %v890_v58  ;;  %v892_v45 = vsel %vm515_vm7, %v890_v58, %v888_v38 }
 0x180   : > { %v594_v50 = vmul.f32 %v1544_v35, %v584_v59  ;;  %v595_v62 = vmul.f32 %v1549_v36, %v585_v1  ;;  %v893_v3 = vmul.f32 %v892_v45, %v521_v44  ;;  %v894_v4 = vmul.f32 %v891_v2, %v525_v47 }
 0x181   : > { %v534_v34 = vsel %vm532_vm5, %v531_v11, %v1595_v63  ;;  %v491_v63 = vrot.slane %v1577_v56, %v486_v7  ;;  %v510_v38 = vmul.f32 %v508_v42, %v499_v25 }
 0x182   : > { %v604_v8 = vpack.c.bf16 %v594_v50, %v594_v50  ;;  %v605_v9 = vpack.c.bf16 %v595_v62, %v595_v62  ;;  %v929_v35 = vpack.c.bf16 %v893_v3, %v885_v53  ;;  %v459_v10 = vpop.permute.xlu1 %458  ;;  %v461_v36 = vpop.permute.xlu0 %460  ;;  %v930_v12 = vpack.c.bf16 %v894_v4, %v886_v54  ;;  %v321_v4 = vld [vmem:[%s1863_s3] sm:$0xf] }
 0x183   : > { %v544_v46 = vmul.f32 %v542_v16, %v534_v34  ;;  %v602_v16 = vpack.c.bf16 %v577_v18, %v560_v22  ;;  %v465_v15 = vsel %vm464_vm9, %v459_v10, %v461_v36  ;;  %v599_v56 = vpack.c.bf16 %v527_v28, %v510_v38  ;;  %v1728_v34 = vpop.f32.mrf.mxu1 }
 0x184   : > { %1167 = vmatprep.subr.msk.bf16.mxu0 %vm615_vm2, %v605_v9  ;;  %955 = vmatprep.subr.bf16.mxu1 %v930_v12  ;;  %v617_v60 = vsel %vm615_vm2, %v604_v8, 0  ;;  %v476_v42 = vmul.f32 %v474_v33, %v465_v15  ;;  %v466_v49 = vsel %vm464_vm9, %v461_v36, %v459_v10 }
 0x185   : > { %629 = vmatpush1.bf16.msra.mxu0 %v617_v60  ;;  %956 = vmatpush1.bf16.msra.mxu1 %v929_v35  ;;  %v601_v31 = vpack.c.bf16 %v544_v46, %v1471_v20  ;;  %v487_v20 = vrot.slane %v1571_v52, %v486_v7  ;;  %v475_v45 = vmul.f32 %v470_v27, %v466_v49  ;;  %v1730_v7 = vpop.f32.mrf.mxu0  ;;  %v1732_v8 = vpop.f32.mrf.mxu1 }
 0x186   : > { %v478_v61 = vpop.permute.xlu1 %477  ;;  %630 = vmatprep.subr.bf16.mxu0 %v603_v21  ;;  %v480_v11 = vpop.permute.xlu0 %479 }
 0x187   : > { %v482_v29 = vsel %vm481_vm8, %v478_v61, %v480_v11  ;;  %v483_v17 = vsel %vm481_vm8, %v480_v11, %v478_v61  ;;  %v1734_v9 = vpop.f32.mrf.mxu0  ;;  %v1736_v35 = vpop.f32.mrf.mxu1 }
 0x188   : > { %v493_v19 = vmul.f32 %v491_v63, %v482_v29  ;;  %v492_v53 = vmul.f32 %v487_v20, %v483_v17 }
 0x189   : > { %631 = vmatpush1.bf16.msra.mxu0 %v602_v16  ;;  %v1738_v10 = vpop.f32.mrf.mxu0  ;;  %v1740_v36 = vpop.f32.mrf.mxu1 }
 0x18a   : > { %v864_v26 = vpop.permute.xlu1 %863  ;;  %632 = vmatprep.subr.bf16.mxu0 %v601_v31  ;;  %v866_v30 = vpop.permute.xlu0 %865  ;;  %v597_v55 = vpack.c.bf16 %v493_v19, %v476_v42  ;;  %v596_v3 = vpack.c.bf16 %v492_v53, %v475_v45  ;;  %v1264_v42 = vld [vmem:[%s1865_s5] sm:$0xff]  }
 0x18b   : > { %v867_v44 = vsel %vm464_vm9, %v864_v26, %v866_v30  ;;  %v868_v47 = vsel %vm464_vm9, %v866_v30, %v864_v26  ;;  %v1742_v12 = vpop.f32.mrf.mxu0  ;;  %v1744_v18 = vpop.f32.mrf.mxu1 }
 0x18c   : > { %v869_v58 = vmul.f32 %v868_v47, %v470_v27  ;;  %v870_v59 = vmul.f32 %v867_v44, %v474_v33  ;;  %v1265_v44 = vld [vmem:[%s1865_s5 + $0x8] sm:$0xff]  }
 0x18d   : > { %633 = vmatpush1.bf16.msra.mxu0 %v600_v40  ;;  %v1746_v37 = vpop.f32.mrf.mxu0  ;;  %v1748_v46 = vpop.f32.mrf.mxu1 }
 0x18e   : > { %v872_v51 = vpop.permute.xlu1 %871  ;;  %634 = vmatprep.subr.bf16.mxu0 %v599_v56  ;;  %v874_v41 = vpop.permute.xlu0 %873 }
 0x18f   : > { %v875_v54 = vsel %vm481_vm8, %v872_v51, %v874_v41  ;;  %v876_v52 = vsel %vm481_vm8, %v874_v41, %v872_v51  ;;  %v1750_v60 = vpop.f32.mrf.mxu0  ;;  %v1752_v21 = vpop.f32.mrf.mxu1 }
 0x190   : > { %v877_v1 = vmul.f32 %v876_v52, %v487_v20  ;;  %v878_v2 = vmul.f32 %v875_v54, %v491_v63 }
 0x191   : > { %635 = vmatpush1.bf16.msra.mxu0 %v598_v14  ;;  %v453_v22 = vpop.f32.mrf.mxu0  ;;  %v858_v23 = vpop.f32.mrf.mxu1 }
 0x192   : > { %v927_v50 = vpack.c.bf16 %v877_v1, %v869_v58  ;;  %636 = vmatprep.subr.bf16.mxu0 %v597_v55  ;;  %v928_v62 = vpack.c.bf16 %v878_v2, %v870_v59 }
 0x193   : > { %v454_v24 = vpop.f32.mrf.mxu0  ;;  %v859_v61 = vpop.f32.mrf.mxu1 }
 0x194   : > { %957 = vmatprep.subr.bf16.mxu1 %v928_v62 }
 0x195   : > { %637 = vmatpush1.bf16.msra.mxu0 %v596_v3  ;;  %958 = vmatpush1.bf16.msra.mxu1 %v927_v50 }
 0x198   : > { %1168 = vmatmul.mubr.msk.bf16.vlgmr.msra.gmra.mxu0 %vm611_vm10, %v321_v4  ;;  %1182 = vmatmul.mubr.msk.bf16.vlgmr.msra.gmra.mxu1 %vm611_vm10, %v321_v4 }
 0x199   : > { %742 = vmatprep.mubr.bf16.mxu0 %v1328_v0  ;;  %1026 = vmatprep.mubr.bf16.mxu1 %v1328_v0 }
 0x19b   : > { %v609_v63 = vpop.permute.xlu1 %608  ;;  %v345_v47 = vpop.permute.xlu0 %344 }
 0x19c   : > { %v434_v52 = vadd.f32 %v1722_v32, %v345_v47  ;;  %v839_v55 = vadd.f32 %v1724_v5, %v345_v47  ;;  %v436_v59 = vadd.f32 %v1726_v6, %v345_v47  ;;  %v841_v2 = vadd.f32 %v1728_v34, %v345_v47 }
 0x19f   : > { %v355_v14 = vpop.permute.xlu0 %354  ;;  %v350_v49 = vpop.permute.xlu1 %349 }
 0x1a0   : > { %v440_v22 = vadd.f32 %v1730_v7, %v350_v49  ;;  %v845_v24 = vadd.f32 %v1732_v8, %v350_v49  ;;  %v442_v34 = vadd.f32 %v1734_v9, %v350_v49  ;;  %v444_v9 = vadd.f32 %v1738_v10, %v355_v14 }
 0x1a1   : > { %v851_v10 = vadd.f32 %v1744_v18, %v355_v14 }
 0x1a3   : > { %v670_v51 = vpop.permute.xlu0 %669  ;;  %v1767_v54 = vpop.permute.xlu1 %359 }
 0x1a4   : > { %v855_v18 = vadd.f32 %v1748_v46, %v1767_v54 }
 0x1a7   : > { %v675_v61 = vpop.permute.xlu1 %674 }
 0x258   : > { %v656_v11 = vpop.f32.mrf.mxu0  ;;  %v977_v16 = vpop.f32.mrf.mxu1 }
 0x259   : > { %v657_v57 = vadd.f32 %v656_v11, %v609_v63  ;;  %v978_v25 = vadd.f32 %v977_v16, %v609_v63 }
 0x25a   : > { %v658_v48 = vpop.f32.mrf.mxu0  ;;  %v979_v28 = vpop.f32.mrf.mxu1 }
 0x25b   : > { %v663_v29 = vmax.f32 %v657_v57, 0.0  ;;  %v984_v31 = vmax.f32 %v978_v25, 0.0  ;;  %v659_v13 = vadd.f32 %v658_v48, %v609_v63  ;;  %v980_v33 = vadd.f32 %v979_v28, %v609_v63 }
 0x25c   : > { %v660_v38 = vpop.f32.mrf.mxu0  ;;  %v981_v39 = vpop.f32.mrf.mxu1  ;;  %v847_v48 = vadd.f32 %v1736_v35, %v350_v49  ;;  %v849_v35 = vadd.f32 %v1740_v36, %v355_v14 }
 0x25d   : > { %v665_v15 = vpack.c.bf16 %v663_v29, %v663_v29  ;;  %v986_v26 = vpack.c.bf16 %v984_v31, %v984_v31  ;;  %v664_v30 = vmax.f32 %v659_v13, 0.0  ;;  %v985_v40 = vmax.f32 %v980_v33, 0.0  ;;  %v680_v29 = vpop.permute.xlu0 %679  ;;  %v685_v36 = vpop.permute.xlu1 %684 }
 0x25e   : > { %v661_v20 = vpop.f32.mrf.mxu0  ;;  %v982_v19 = vpop.f32.mrf.mxu1 }
 0x25f   : > { %v666_v43 = vpack.c.bf16 %v664_v30, %v664_v30  ;;  %v987_v17 = vpack.c.bf16 %v985_v40, %v985_v40  ;;  %v705_v56 = vsel %vm615_vm2, %v665_v15, 0  ;;  %v989_v27 = vsel %vm615_vm2, %v986_v26, 0 }
 0x261   : > { %1171 = vmatprep.subr.msk.bf16.mxu0 %vm615_vm2, %v666_v43  ;;  %1183 = vmatprep.subr.msk.bf16.mxu1 %vm615_vm2, %v987_v17  ;;  %v446_v17 = vadd.f32 %v1742_v12, %v355_v14 }
 0x262   : > { %725 = vmatpush1.bf16.msra.mxu0 %v705_v56  ;;  %1009 = vmatpush1.bf16.msra.mxu1 %v989_v27 }
 0x265   : > { %1172 = vmatmul.mubr.msk.bf16.vlgmr.msra.gmra.mxu0 %vm697_vm11, %v1264_v42  ;;  %1184 = vmatmul.mubr.msk.bf16.vlgmr.msra.gmra.mxu1 %vm697_vm11, %v1264_v42 }
 0x266   : > { %752 = vmatprep.mubr.bf16.mxu0 %v1328_v0  ;;  %1036 = vmatprep.mubr.bf16.mxu1 %v1328_v0 }
 0x26d   : > { %1173 = vmatmul.mubr.msk.bf16.gmra.mxu0 %vm697_vm11, %v1265_v44  ;;  %1185 = vmatmul.mubr.msk.bf16.gmra.mxu1 %vm697_vm11, %v1265_v44 }
 0x325   : > { %v744_v41 = vpop.f32.mrf.mxu0  ;;  %v1028_v53 = vpop.f32.mrf.mxu1 }
 0x326   : > { %v745_v0 = vadd.f32 %v744_v41, %v670_v51  ;;  %v1029_v58 = vadd.f32 %v1028_v53, %v670_v51  ;;  %v450_v53 = vadd.f32 %v1746_v37, %v1767_v54  ;;  %v452_v37 = vadd.f32 %v1750_v60, %v1767_v54 }
 0x327   : > { %v746_v1 = vpop.f32.mrf.mxu0  ;;  %v1030_v45 = vpop.f32.mrf.mxu1 }
 0x328   : > { %v763_v50 = vadd.f32 %v745_v0, %v434_v52  ;;  %v1047_v62 = vadd.f32 %v1029_v58, %v839_v55  ;;  %v747_v3 = vadd.f32 %v746_v1, %v670_v51  ;;  %v1031_v4 = vadd.f32 %v1030_v45, %v670_v51 }
 0x329   : > { %v748_v23 = vpop.f32.mrf.mxu0  ;;  %v1032_v32 = vpop.f32.mrf.mxu1  ;;  %v857_v45 = vadd.f32 %v1752_v21, %v1767_v54 }
 0x32a   : > { %v771_v63 = vmax.f32 %v763_v50, 0.0  ;;  %v1055_v5 = vmax.f32 %v1047_v62, 0.0  ;;  %v764_v11 = vadd.f32 %v747_v3, %v436_v59  ;;  %v1048_v16 = vadd.f32 %v1031_v4, %v841_v2 }
 0x32b   : > { %v749_v6 = vadd.f32 %v748_v23, %v675_v61  ;;  %v1033_v57 = vadd.f32 %v1032_v32, %v675_v61  ;;  %v750_v25 = vpop.f32.mrf.mxu0  ;;  %v1034_v28 = vpop.f32.mrf.mxu1 }
 0x32c   : > { %779 = vst [vmem:[%s1779_s20] sm:$0xff] %v771_v63  ;;  %1186 = vst [vmem:[%s1779_s20 + $0x40] sm:$0xff] %v1055_v5  ;;  %v772_v7 = vmax.f32 %v764_v11, 0.0  ;;  %v1056_v8 = vmax.f32 %v1048_v16, 0.0  ;;  %v751_v31 = vadd.f32 %v750_v25, %v675_v61  ;;  %v1035_v13 = vadd.f32 %v1034_v28, %v675_v61 }
 0x32d   : > { %v765_v33 = vadd.f32 %v749_v6, %v440_v22  ;;  %v1049_v38 = vadd.f32 %v1033_v57, %v845_v24  ;;  %v754_v39 = vpop.f32.mrf.mxu0  ;;  %v1038_v15 = vpop.f32.mrf.mxu1 }
 0x32e   : > { %780 = vst [vmem:[%s1779_s20 + $0x8] sm:$0xff] %v772_v7  ;;  %1187 = vst [vmem:[%s1779_s20 + $0x48] sm:$0xff] %v1056_v8  ;;  %v766_v26 = vadd.f32 %v751_v31, %v442_v34  ;;  %v1050_v30 = vadd.f32 %v1035_v13, %v847_v48  ;;  %v755_v40 = vadd.f32 %v754_v39, %v680_v29 }
 0x32f   : > { %v1039_v20 = vadd.f32 %v1038_v15, %v680_v29  ;;  %v773_v19 = vmax.f32 %v765_v33, 0.0  ;;  %v1057_v43 = vmax.f32 %v1049_v38, 0.0  ;;  %v756_v56 = vpop.f32.mrf.mxu0  ;;  %v1040_v27 = vpop.f32.mrf.mxu1 }
 0x330   : > { %v774_v42 = vmax.f32 %v766_v26, 0.0  ;;  %v1058_v44 = vmax.f32 %v1050_v30, 0.0  ;;  %v767_v47 = vadd.f32 %v755_v40, %v444_v9  ;;  %v757_v51 = vadd.f32 %v756_v56, %v680_v29 }
 0x331   : > { %v1051_v49 = vadd.f32 %v1039_v20, %v849_v35  ;;  %781 = vst [vmem:[%s1779_s20 + $0x10] sm:$0xff] %v773_v19  ;;  %1188 = vst [vmem:[%s1779_s20 + $0x50] sm:$0xff] %v1057_v43  ;;  %v1041_v41 = vadd.f32 %v1040_v27, %v680_v29  ;;  %v758_v12 = vpop.f32.mrf.mxu0  ;;  %v1042_v14 = vpop.f32.mrf.mxu1 }
 0x332   : > { %782 = vst [vmem:[%s1779_s20 + $0x18] sm:$0xff] %v774_v42  ;;  %1189 = vst [vmem:[%s1779_s20 + $0x58] sm:$0xff] %v1058_v44  ;;  %v775_v52 = vmax.f32 %v767_v47, 0.0  ;;  %v759_v55 = vadd.f32 %v758_v12, %v685_v36  ;;  %v1043_v58 = vadd.f32 %v1042_v14, %v685_v36  ;;  %v768_v59 = vadd.f32 %v757_v51, %v446_v17 }
 0x333   : > { %v1059_v0 = vmax.f32 %v1051_v49, 0.0  ;;  %v1052_v1 = vadd.f32 %v1041_v41, %v851_v10  ;;  %v760_v2 = vpop.f32.mrf.mxu0  ;;  %v1044_v46 = vpop.f32.mrf.mxu1 }
 0x334   : > { %783 = vst [vmem:[%s1779_s20 + $0x20] sm:$0xff] %v775_v52  ;;  %v769_v50 = vadd.f32 %v759_v55, %v450_v53  ;;  %v1053_v62 = vadd.f32 %v1043_v58, %v855_v18  ;;  %v761_v3 = vadd.f32 %v760_v2, %v685_v36  ;;  %v1045_v4 = vadd.f32 %v1044_v46, %v685_v36 }
 0x335   : > { %1190 = vst [vmem:[%s1779_s20 + $0x60] sm:$0xff] %v1059_v0  ;;  %v776_v60 = vmax.f32 %v768_v59, 0.0  ;;  %v1060_v22 = vmax.f32 %v1052_v1, 0.0 }
 0x336   : > { %v777_v23 = vmax.f32 %v769_v50, 0.0  ;;  %v1061_v21 = vmax.f32 %v1053_v62, 0.0  ;;  %v770_v54 = vadd.f32 %v761_v3, %v452_v37  ;;  %v1054_v24 = vadd.f32 %v1045_v4, %v857_v45 }
 0x337   : > { %784 = vst [vmem:[%s1779_s20 + $0x28] sm:$0xff] %v776_v60  ;;  %1191 = vst [vmem:[%s1779_s20 + $0x68] sm:$0xff] %v1060_v22 }
 0x338   : > { %785 = vst [vmem:[%s1779_s20 + $0x30] sm:$0xff] %v777_v23  ;;  %1192 = vst [vmem:[%s1779_s20 + $0x70] sm:$0xff] %v1061_v21  ;;  %v778_v32 = vmax.f32 %v770_v54, 0.0  ;;  %v1062_v61 = vmax.f32 %v1054_v24, 0.0 }
 0x33a   : > { %786 = vst [vmem:[%s1779_s20 + $0x38] sm:$0xff] %v778_v32  ;;  %1193 = vst [vmem:[%s1779_s20 + $0x78] sm:$0xff] %v1062_v61 }
 0x33b   : > { %1279 = shalt.err (!%p1276_p3)
}
 0x33c   : > { %s1280_s17 = scalar_lea.hbm %s1810_s25, 2048  ;;  %s1284_s20 = scalar_lea.hbm %s1868_s8, 4096 }
 0x33d   : > { %p1281_p4 = scmp.ne.s32.totalorder %s1810_s25, %s1280_s17  ;;  %p1285_p9 = scmp.lt.s32.totalorder %s1810_s25, %s1868_s8 }
 0x33e   : > { %p1286_p10 = scmp.lt.s32.totalorder %s1284_s20, %s1280_s17 }
 0x33f   : > { %p1282_p7 = pnand %p1281_p4, %p1423_p5 }
 0x340   : > { %p1287_p11 = por %p1286_p10, %p1285_p9 }
 0x341   : > { %p1283_p8 = pneg %p1282_p7 }
 0x343   : > { %p1288_p12 = pnand %p1287_p11, %p1283_p8 }
 0x345   : > { %1291 = shalt.err (!%p1288_p12)
}
 0x346   : > { %s1338_s24 = smov 256   ;;  %s1339_s26 = smov 16  }
 0x347   : > { %1203 = dma.vmem_to_hbm [thread:$0]  (%p1423_p5), %s1812_s22, 2048, %s1810_s25, %s1820_s9, %s1338_s24, %s1338_s24, %s1339_s26  }
 0x348 PF: > { %p1209_p13 = scmp.ge.s32.totalorder %s1326_s30, 2  ;;  %s1102_s10 = sand.u32 1, %s1314_s27  }
 0x349   : > { %s1103_s12 = scalar_lea.sflag [#allocation3], %s1102_s10 }
 0x34a   : > { %p1206_p0 = pnand %p1209_p13, %p1427_p6 }
 0x34c   : > { %p1207_p1 = pneg %p1206_p0 }
 0x34e   : > { %1309 = dma.done.wait (%p1207_p1), %s1103_s12, 2048  }
 0x34f   : > { %1311 = vsyncadd (%p1207_p1), %s1103_s12, 4294965248  ;;  %p18_p2 = scmp.ge.s32.totalorder %s1410_s11, 4   ;;  %s1871_s27 = smov %s1318_s28 }
 0x350   : > { %s1872_s28 = smov %s1322_s29  ;;  %s1873_s29 = smov %s1421_s14 }
 0x351   : > { %s1874_s30 = smov %s1410_s11  ;;  %20 = sbr.rel (!%p18_p2) target bundleno = 3 (0x3), region = 89 }
 0x356   :  { %1108 = vsyncpa [#allocation3], 1 }
 0x357   :  { %1110 = vsyncpa [#allocation3 + $0x1], 1 }

</bundles_post_ra>
